<compile_context>
chip_gen: v7x
topology: tpu7x:2x2x1
jax: 0.10.0
libtpu: 0.0.40
codegen_flags: <defaults>
</compile_context>

<pallas_src>
import functools

import jax
import jax.numpy as jnp
from jax.experimental import pallas as pl
from jax.experimental.pallas import tpu as pltpu

HBEAD = 6            # number of Linear(64,64) layers in the original module
FEAT = 64            # in/out features of each layer
PACK = 2             # samples packed per 128-lane row
LANES = FEAT * PACK  # 128 lanes (full vreg width)


def _round_up(n, m):
    return ((n + m - 1) // m) * m


# ---------------------------------------------------------------------------
# Parameter prep (done once): collapse the 6-layer stack, then lane-pack it.
# ---------------------------------------------------------------------------
def collapse_params(weights, biases):
    """weights: (HBEAD, out, in) PyTorch layout; biases: (HBEAD, out).
    Returns W_eff (in,out) f32 and b_eff (out,) f32 such that
      x @ W_eff + b_eff == Linear_6(...(Linear_1(x))...)."""
    w_eff = jnp.eye(FEAT, dtype=jnp.float32)
    b_eff = jnp.zeros((FEAT,), dtype=jnp.float32)
    for l in range(HBEAD):
        w_l = weights[l].T.astype(jnp.float32)       # (in, out) for this layer
        w_eff = w_eff @ w_l
        b_eff = b_eff @ w_l + biases[l].astype(jnp.float32)
    return w_eff, b_eff


def pack_params(weights, biases, io_dtype=jnp.float32):
    """Build the lane-dense parameters:
      W_block (128,128) block-diagonal (two exact copies of W_eff; exact zeros
      off-diagonal so packed samples never leak), cast to io_dtype,
      b_block (1,128) kept in f32 (added on the f32 accumulator)."""
    w_eff, b_eff = collapse_params(weights, biases)
    w_block = jnp.zeros((LANES, LANES), jnp.float32)
    w_block = w_block.at[:FEAT, :FEAT].set(w_eff)
    w_block = w_block.at[FEAT:, FEAT:].set(w_eff)
    b_block = jnp.concatenate([b_eff, b_eff]).reshape(1, LANES)
    return w_block.astype(io_dtype), b_block


# ---------------------------------------------------------------------------
# Kernel: one (tb, 128) @ (128, 128) + bias per grid step (f32 accumulation).
# ---------------------------------------------------------------------------
def encoder_kernel(x_ref, w_ref, b_ref, o_ref):
    acc = jnp.dot(x_ref[...], w_ref[...], preferred_element_type=jnp.float32)
    o_ref[...] = (acc + b_ref[...]).astype(o_ref.dtype)


# ---------------------------------------------------------------------------
# Wrapper: lane-packed, batch-tiled pallas_call.
# ---------------------------------------------------------------------------
@functools.partial(jax.jit, static_argnames=("tb_rows", "out_dtype"))
def encoder_forward(x, w_block, b_block, *, tb_rows=4096, out_dtype=None):
    """x: (B, 64); w_block: (128, 128) block-diagonal effective weight
    (dtype = HBM I/O dtype, f32 or bf16); b_block: (1, 128) f32."""
    B, feat = x.shape
    assert feat == FEAT, f"expected {FEAT} features, got {feat}"
    io_dtype = w_block.dtype
    if out_dtype is None:
        out_dtype = x.dtype

    two_byte = (jnp.dtype(io_dtype).itemsize < 4
                or jnp.dtype(out_dtype).itemsize < 4)
    sub = 16 if two_byte else 8          # sublane granularity (bf16 packs 2x)

    # Pad B only to the packing/sublane requirement, never to a tile multiple.
    B_pad = _round_up(max(B, 1), PACK * sub)
    if x.dtype != io_dtype:
        x = x.astype(io_dtype)
    if B_pad != B:
        x = jnp.pad(x, ((0, B_pad - B), (0, 0)))

    rows = B_pad // PACK                 # packed rows, 128 lanes each
    xp = x.reshape(rows, LANES)          # contiguous, free reshape

    # Batch tile in packed rows. Keep >= 2 grid steps whenever possible so the
    # "parallel" axis can be sharded across both TensorCores (v7x megacore).
    if rows >= 2 * sub:
        tb = min(tb_rows, _round_up((rows + 1) // 2, sub))
    else:
        tb = rows
    grid = (pl.cdiv(rows, tb),)

    out = pl.pallas_call(
        encoder_kernel,
        out_shape=jax.ShapeDtypeStruct((rows, LANES), out_dtype),
        grid_spec=pltpu.PrefetchScalarGridSpec(
            num_scalar_prefetch=0,
            grid=grid,
            in_specs=[
                pl.BlockSpec((tb, LANES), lambda i: (i, 0)),     # activations
                pl.BlockSpec((LANES, LANES), lambda i: (0, 0)),  # W (resident)
                pl.BlockSpec((1, LANES), lambda i: (0, 0)),      # bias (resident)
            ],
            out_specs=pl.BlockSpec((tb, LANES), lambda i: (i, 0)),
        ),
        compiler_params=pltpu.CompilerParams(
            dimension_semantics=("parallel",)),   # both TCs on v7x
    )(xp, w_block, b_block)

    out = out.reshape(B_pad, FEAT)
    return out[:B] if B_pad != B else out


# ---------------------------------------------------------------------------
# Init / reference (mirror the PyTorch module).
# ---------------------------------------------------------------------------
def init_params(key):
    """PyTorch nn.Linear default init: U(-1/sqrt(in), 1/sqrt(in))."""
    bound = 1.0 / jnp.sqrt(jnp.float32(FEAT))
    kw, kb = jax.random.split(key)
    weights = jax.random.uniform(
        kw, (HBEAD, FEAT, FEAT), jnp.float32, -bound, bound)   # (out, in)
    biases = jax.random.uniform(
        kb, (HBEAD, FEAT), jnp.float32, -bound, bound)
    return weights, biases


def reference_forward(x, weights, biases):
    """Plain-JAX reference of the PyTorch forward (i=1): 6 chained Linears."""
    h = x
    for l in range(HBEAD):
        h = h @ weights[l].T + biases[l]
    return h


if __name__ == "__main__":
    key = jax.random.PRNGKey(0)
    kx, kp = jax.random.split(key)

    B = 8
    x = jax.random.normal(kx, (B, FEAT), jnp.float32)
    weights, biases = init_params(kp)
    ref = reference_forward(x, weights, biases)

    # ---- f32 I/O path (exact-ish; matches reference to tight tolerance) ----
    w_blk32, b_blk = pack_params(weights, biases, io_dtype=jnp.float32)
    out32 = jax.block_until_ready(encoder_forward(x, w_blk32, b_blk))
    assert out32.shape == (B, FEAT)
    assert jnp.allclose(out32, ref, atol=1e-4, rtol=1e-4), "f32 mismatch vs reference"

    # ---- bf16 I/O path (halves HBM bytes; f32 accumulation in the MXU) -----
    w_blk16, b_blk16 = pack_params(weights, biases, io_dtype=jnp.bfloat16)
    x16 = x.astype(jnp.bfloat16)   # upstream producer would emit bf16 directly
    out16 = jax.block_until_ready(
        encoder_forward(x16, w_blk16, b_blk16, out_dtype=jnp.float32))
    assert out16.shape == (B, FEAT)
    assert jnp.allclose(out16.astype(jnp.float32), ref, atol=3e-2, rtol=3e-2), \
        "bf16 mismatch vs reference"

    print("KERNEL_OK")
</pallas_src>

<mosaic_0001>
module attributes {stable_mosaic.version = 11 : i64} {
  func.func @encoder_kernel(%arg0: i32, %arg1: memref<8x128xf32, #tpu.memory_space<vmem>>, %arg2: memref<128x128xf32, #tpu.memory_space<vmem>>, %arg3: memref<1x128xf32, #tpu.memory_space<vmem>>, %arg4: memref<8x128xf32, #tpu.memory_space<vmem>>) attributes {dimension_semantics = [#tpu.dimension_semantics<parallel>], iteration_bounds = array<i64: 1>, scalar_prefetch = 0 : i64, scratch_operands = 0 : i64, tpu.core_type = #tpu.core_type<tc>, window_params = [{transform_indices = @transform_0, window_bounds = array<i64: 8, 128>}, {pipeline_mode = #tpu.pipeline_mode<synchronous>, transform_indices = @transform_1, window_bounds = array<i64: 128, 128>}, {pipeline_mode = #tpu.pipeline_mode<synchronous>, transform_indices = @transform_2, window_bounds = array<i64: 1, 128>}, {transform_indices = @transform_3, window_bounds = array<i64: 8, 128>}]} {
    %c0 = arith.constant 0 : index
    %c0_0 = arith.constant 0 : index
    %0 = vector.load %arg1[%c0, %c0_0] : memref<8x128xf32, #tpu.memory_space<vmem>>, vector<8x128xf32>
    %c0_1 = arith.constant 0 : index
    %c0_2 = arith.constant 0 : index
    %1 = vector.load %arg2[%c0_1, %c0_2] : memref<128x128xf32, #tpu.memory_space<vmem>>, vector<128x128xf32>
    %cst = arith.constant dense<0.000000e+00> : vector<8x128xf32>
    %2 = tpu.matmul %0, %1, %cst {dimension_numbers = #tpu.dot_dimension_numbers<[1], [0], [0], [1], [0, 0, 1, 1], [], []>} : vector<8x128xf32>, vector<128x128xf32>, vector<8x128xf32> -> vector<8x128xf32>
    %c0_3 = arith.constant 0 : index
    %c0_4 = arith.constant 0 : index
    %3 = vector.load %arg3[%c0_3, %c0_4] : memref<1x128xf32, #tpu.memory_space<vmem>>, vector<1x128xf32>
    %4 = vector.broadcast %3 : vector<1x128xf32> to vector<8x128xf32>
    %5 = arith.addf %2, %4 : vector<8x128xf32>
    %c0_5 = arith.constant 0 : index
    %c0_6 = arith.constant 0 : index
    %6 = vector.load %arg4[%c0_5, %c0_6] : memref<8x128xf32, #tpu.memory_space<vmem>>, vector<8x128xf32>
    tpu.vector_store %arg4[%c0_5, %c0_6], %5 {strides = array<i32>} : memref<8x128xf32, #tpu.memory_space<vmem>>, vector<8x128xf32>,
    return
  }
  func.func @transform_0(%arg0: i32) -> (i32, i32) {
    %c0_i32 = arith.constant 0 : i32
    %c0_i32_0 = arith.constant 0 : i32
    return %arg0, %c0_i32 : i32, i32
  }
  func.func @transform_1(%arg0: i32) -> (i32, i32) {
    %c0_i32 = arith.constant 0 : i32
    %c0_i32_0 = arith.constant 0 : i32
    %c0_i32_1 = arith.constant 0 : i32
    return %c0_i32, %c0_i32_0 : i32, i32
  }
  func.func @transform_2(%arg0: i32) -> (i32, i32) {
    %c0_i32 = arith.constant 0 : i32
    %c0_i32_0 = arith.constant 0 : i32
    %c0_i32_1 = arith.constant 0 : i32
    return %c0_i32, %c0_i32_0 : i32, i32
  }
  func.func @transform_3(%arg0: i32) -> (i32, i32) {
    %c0_i32 = arith.constant 0 : i32
    %c0_i32_0 = arith.constant 0 : i32
    return %arg0, %c0_i32 : i32, i32
  }
}

</mosaic_0001>

<bundles_post_ra>
// kernel: encoder_forward.1
= control target key start
LH: loop header
LB: loop body
LE: loop exit
PB: predicated region body
PF: predicated region fallthrough
CT: control target
= control target key end

     0   :  { %8 = vsyncpa [#allocation3], 0  ;;  %s235_s12 = smov [#allocation2]   ;;  %s282_s0 = inlined_call_operand.vmem [shape: f32[8,128], index: 0, kind: input, shape index: {}]   ;;  %s283_s1 = inlined_call_operand.hbm [shape: f32[128,128], index: 1, kind: input, shape index: {}]   ;;  %s284_s2 = inlined_call_operand.vmem [shape: f32[1,128], index: 2, kind: input, shape index: {}]   ;;  %s285_s3 = inlined_call_operand.vmem [shape: f32[8,128], index: 3, kind: output, shape index: {}]  }
   0x1   :  { %s16_s13 = sshll.u32 %s235_s12, 4  ;;  %s211_s16 = scalar_lea.hbm %s283_s1, 2048  ;;  %s17_s13 = int_to_ptr.vmem [resolvable:$true] %s16_s13 }
   0x2   :  { %p212_p0 = scmp.ne.s32.totalorder %s283_s1, %s211_s16  ;;  %p215_p1 = scmp.lt.u32.totalorder %s211_s16, %s283_s1 }
   0x4   :  { %p217_p2 = pnand %p215_p1, %p212_p0 }
   0x6   :  { %220 = shalt.err (!%p217_p2)
}
   0x7   :  { %s221_s21 = scalar_lea.vmem %s17_s13, 2048  ;;  %p226_p4 = scmp.lt.s32.totalorder %s17_s13, %s17_s13 }
   0x8   :  { %p222_p3 = scmp.ne.s32.totalorder %s17_s13, %s221_s21  ;;  %p227_p5 = scmp.lt.s32.totalorder %s221_s21, %s221_s21 }
   0xa   :  { %p228_p6 = por %p227_p5, %p226_p4 }
   0xc   :  { %p229_p7 = pnand %p228_p6, %p222_p3 }
   0xe   :  { %232 = shalt.err (!%p229_p7)
}
   0xf   :  { %s236_s22 = smov 128   ;;  %s237_s23 = smov 8  }
  0x10   :  { %22 = dma.hbm_to_vmem [thread:$0]  %s283_s1, 2048, %s17_s13, [#allocation3], %s236_s22, %s236_s22, %s237_s23  }
  0x11   :  { %233 = dma.done.wait [#allocation3], 2048  }
  0x12   :  { %234 = vsyncadd [#allocation3], 4294965248  ;;  %v238_v0 = vmov 0.0|0.0   ;;  %vm239_vm0 = vmmov 0   ;;  %v240_v1 = vmov 0.0   ;;  %v29_v2 = vld [vmem:[#allocation2] sm:$0xff] }
  0x13   :  { %181 = vmatprep.subr.bf16.mxu0 %v238_v0  ;;  %178 = vmatprep.mubr.msk.f32.mxu0 %vm239_vm0, %v240_v1  ;;  %v30_v3 = vld [vmem:[#allocation2 + $0x8] sm:$0xff]  ;;  %v31_v4 = vld [vmem:[#allocation2 + $0x10] sm:$0xff]  ;;  %v32_v6 = vld [vmem:[#allocation2 + $0x18] sm:$0xff] }
  0x14   :  { %v182_v5 = vpack.c.bf16 %v30_v3, %v29_v2  ;;  %v185_v7 = vpack.c.bf16 %v32_v6, %v31_v4  ;;  %v33_v8 = vld [vmem:[#allocation2 + $0x20] sm:$0xff]  ;;  %v34_v9 = vld [vmem:[#allocation2 + $0x28] sm:$0xff]  ;;  %v35_v11 = vld [vmem:[#allocation2 + $0x30] sm:$0xff] }
  0x15   :  { %v188_v10 = vpack.c.bf16 %v34_v9, %v33_v8  ;;  %v36_v12 = vld [vmem:[#allocation2 + $0x38] sm:$0xff]  ;;  %v37_v14 = vld [vmem:[#allocation2 + $0x40] sm:$0xff]  ;;  %v38_v15 = vld [vmem:[#allocation2 + $0x48] sm:$0xff] }
  0x16   :  { %183 = vmatpush3.bf16.msra.mxu0 %v182_v5  ;;  %v191_v13 = vpack.c.bf16 %v36_v12, %v35_v11  ;;  %v194_v16 = vpack.c.bf16 %v38_v15, %v37_v14  ;;  %v39_v17 = vld [vmem:[#allocation2 + $0x50] sm:$0xff]  ;;  %v40_v18 = vld [vmem:[#allocation2 + $0x58] sm:$0xff]  ;;  %v41_v20 = vld [vmem:[#allocation2 + $0x60] sm:$0xff] }
  0x17   :  { %184 = vmatprep.subr.bf16.mxu0 %v238_v0  ;;  %v197_v19 = vpack.c.bf16 %v40_v18, %v39_v17  ;;  %v42_v21 = vld [vmem:[#allocation2 + $0x68] sm:$0xff]  ;;  %v43_v23 = vld [vmem:[#allocation2 + $0x70] sm:$0xff]  ;;  %v44_v24 = vld [vmem:[#allocation2 + $0x78] sm:$0xff] }
  0x18   :  { %v200_v22 = vpack.c.bf16 %v42_v21, %v41_v20  ;;  %v203_v25 = vpack.c.bf16 %v44_v24, %v43_v23  ;;  %v28_v26 = vld [vmem:[%s282_s0] sm:$0xff] }
  0x19   :  { %v128_v27 = vld [vmem:[%s284_s2] ss:$0 sm:$0xff] }
  0x1a   :  { %186 = vmatpush3.bf16.msra.mxu0 %v185_v7 }
  0x1b   :  { %187 = vmatprep.subr.bf16.mxu0 %v238_v0 }
  0x1e   :  { %189 = vmatpush3.bf16.msra.mxu0 %v188_v10 }
  0x1f   :  { %190 = vmatprep.subr.bf16.mxu0 %v238_v0 }
  0x22   :  { %192 = vmatpush3.bf16.msra.mxu0 %v191_v13 }
  0x23   :  { %193 = vmatprep.subr.bf16.mxu0 %v238_v0 }
  0x26   :  { %195 = vmatpush3.bf16.msra.mxu0 %v194_v16 }
  0x27   :  { %196 = vmatprep.subr.bf16.mxu0 %v238_v0 }
  0x2a   :  { %198 = vmatpush3.bf16.msra.mxu0 %v197_v19 }
  0x2b   :  { %199 = vmatprep.subr.bf16.mxu0 %v238_v0 }
  0x2e   :  { %201 = vmatpush3.bf16.msra.mxu0 %v200_v22 }
  0x2f   :  { %202 = vmatprep.subr.bf16.mxu0 %v238_v0 }
  0x32   :  { %204 = vmatpush3.bf16.msra.mxu0 %v203_v25 }
  0x35   :  { %179 = vmatmul.mubr.f32.vlgmr.msra.gmra.mrb[0].mxu0 %v28_v26 }
 0x108   :  { %v118_v28 = vpop.f32.mrb[0].mxu0 }
 0x109   :  { %v119_v29 = vadd.f32 %v128_v27, %v118_v28  ;;  %v180_v30 = vpop.f32.mrb[1].mxu0 }
 0x10b   :  { %122 = vst [vmem:[%s285_s3] sm:$0xff] %v119_v29 }
 0x10c   :  { %127 = vsyncpa [#allocation3], 1 }

</bundles_post_ra>
